<compile_context>
chip_gen: v7x
topology: tpu7x:2x2x1
jax: 0.10.0
libtpu: 0.0.40
codegen_flags: <defaults>
</compile_context>

<pallas_src>
import math

import jax
import jax.numpy as jnp
from jax.experimental import pallas as pl
from jax.experimental.pallas import tpu as pltpu


# ----------------------------------------------------------------------------
# Kernels
# ----------------------------------------------------------------------------

def _make_fused_kernel(bblk, N, n_in, n_global):
    """Single pass: whole point axis resident per grid step."""
    def kernel(feat_ref, w_ref, b_ref, out_ref):
        # feat_ref: (bblk, N, n_in)   w_ref: (n_in, n_global)
        # b_ref:    (1, n_global)     out_ref: (bblk, N, n_in + n_global)
        feat = feat_ref[...]

        # One MXU push for the whole block, f32 accumulate.
        tran = jnp.dot(feat.reshape(bblk * N, n_in), w_ref[...],
                       preferred_element_type=jnp.float32)
        tran = tran.reshape(bblk, N, n_global)

        # Reduce over the point axis, then add bias once per column.
        glob = jnp.max(tran, axis=1) + b_ref[...]            # (bblk, n_global)

        # Two direct slice stores -- no concatenated (N, out_dim) temporary.
        out_ref[:, :, :n_in] = feat.astype(out_ref.dtype)
        out_ref[:, :, n_in:] = jnp.broadcast_to(
            glob[:, None, :], (bblk, N, n_global)).astype(out_ref.dtype)

    return kernel


def _make_max_kernel(bblk, nblk, n_in, n_global):
    """Tiled pass A: running max over point tiles, bias folded in at the end.

    Output glob block index is constant across the point-tile axis, so the
    f32 accumulator lives directly in the resident output block (no scratch).
    """
    def kernel(feat_ref, w_ref, b_ref, glob_ref):
        j = pl.program_id(1)

        @pl.when(j == 0)
        def _():
            glob_ref[...] = jnp.full_like(glob_ref, -jnp.inf)

        feat = feat_ref[...]                                  # (bblk, nblk, n_in)
        tran = jnp.dot(feat.reshape(bblk * nblk, n_in), w_ref[...],
                       preferred_element_type=jnp.float32)
        tile_max = jnp.max(tran.reshape(bblk, nblk, n_global), axis=1)
        glob_ref[...] = jnp.maximum(glob_ref[...], tile_max[:, None, :])

        @pl.when(j == pl.num_programs(1) - 1)
        def _():
            glob_ref[...] = glob_ref[...] + b_ref[...]

    return kernel


def _make_concat_kernel(bblk, nblk, n_in, n_global):
    """Tiled pass B: stream feat tiles, write concat(feat, broadcast(glob))."""
    def kernel(feat_ref, glob_ref, out_ref):
        feat = feat_ref[...]                                  # (bblk, nblk, n_in)
        glob = glob_ref[...]                                  # (bblk, 1, n_global)
        out_ref[:, :, :n_in] = feat.astype(out_ref.dtype)
        out_ref[:, :, n_in:] = jnp.broadcast_to(
            glob, (bblk, nblk, n_global)).astype(out_ref.dtype)

    return kernel


# ----------------------------------------------------------------------------
# Block-size selection
# ----------------------------------------------------------------------------

def _choose_bblk(B, per_item_bytes, vmem_block_budget_bytes):
    """Largest divisor of B whose (double-buffered) blocks fit the budget."""
    max_items = max(1, vmem_block_budget_bytes // (2 * per_item_bytes))
    cap = min(B, max_items)
    if B >= 2:
        # keep at least 2 grid steps so v7x can shard the axis over its 2 TCs
        cap = min(cap, max(1, B // 2))
    for d in range(cap, 0, -1):
        if B % d == 0:
            return d
    return 1


def _choose_nblk(N, per_point_bytes, vmem_block_budget_bytes):
    """Largest point tile that (a) divides N, (b) is a multiple of 8 (or == N,
    satisfying Mosaic's sublane rule), and (c) fits the double-buffered budget."""
    cap = max(1, vmem_block_budget_bytes // (2 * per_point_bytes))
    cands = [d for d in range(N, 0, -1)
             if N % d == 0 and (d == N or d % 8 == 0)]
    fitting = [d for d in cands if d <= cap]
    if fitting:
        return fitting[0]          # largest fitting candidate
    return cands[-1]               # smallest legal tile; vmem limit bumped below


def _vmem_limit(required_bytes):
    return int(min(64 * 1024 * 1024, max(required_bytes + (4 << 20), 16 << 20)))


# ----------------------------------------------------------------------------
# Public wrapper
# ----------------------------------------------------------------------------

def global_info_prop(feat, weight, bias, *, io_dtype=None,
                     vmem_block_budget_bytes=16 * 1024 * 1024,
                     force_tiled=False, point_block=None):
    """feat: [B, N, n_in], weight: [n_in, n_global], bias: [n_global]."""
    B, N, n_in = feat.shape
    n_global = weight.shape[1]
    out_dim = n_in + n_global

    if io_dtype is not None:
        # Optional reduced-precision I/O for memory-bound speedup (v6e/v7x).
        feat = feat.astype(io_dtype)
        weight = weight.astype(io_dtype)
        bias = bias.astype(io_dtype)
    out_dtype = feat.dtype
    bias2d = bias.reshape(1, n_global)

    in_isz = feat.dtype.itemsize
    out_isz = jnp.dtype(out_dtype).itemsize
    per_point = n_in * in_isz + out_dim * out_isz
    per_item = N * per_point
    w_bytes = (weight.size * weight.dtype.itemsize
               + bias2d.size * bias2d.dtype.itemsize)

    fused_fits = (2 * per_item + w_bytes) <= vmem_block_budget_bytes

    if fused_fits and not force_tiled:
        # --------------------------- fused single pass ----------------------
        bblk = _choose_bblk(B, per_item, vmem_block_budget_bytes)
        required = 2 * bblk * per_item + w_bytes
        kernel = _make_fused_kernel(bblk, N, n_in, n_global)
        return pl.pallas_call(
            kernel,
            out_shape=jax.ShapeDtypeStruct((B, N, out_dim), out_dtype),
            grid_spec=pltpu.PrefetchScalarGridSpec(
                num_scalar_prefetch=0,
                grid=(B // bblk,),
                in_specs=[
                    pl.BlockSpec((bblk, N, n_in), lambda b: (b, 0, 0)),
                    pl.BlockSpec((n_in, n_global), lambda b: (0, 0)),
                    pl.BlockSpec((1, n_global), lambda b: (0, 0)),
                ],
                out_specs=pl.BlockSpec((bblk, N, out_dim), lambda b: (b, 0, 0)),
            ),
            compiler_params=pltpu.CompilerParams(
                dimension_semantics=("parallel",),
                vmem_limit_bytes=_vmem_limit(required)),
        )(feat, weight, bias2d)

    # ------------------------------- tiled two pass --------------------------
    # bblk = 1: the point-tile axis already amortises per-step overhead for the
    # large-N shapes that take this path.
    bblk = 1
    if point_block is not None:
        nblk = int(point_block)
        if N % nblk != 0 or not (nblk == N or nblk % 8 == 0):
            raise ValueError(f"point_block={nblk} must divide N={N} and be a "
                             f"multiple of 8 (or equal N)")
    else:
        nblk = _choose_nblk(N, per_point, vmem_block_budget_bytes)
    grid = (B // bblk, N // nblk)

    feat_tile = bblk * nblk * n_in * in_isz
    out_tile = bblk * nblk * out_dim * out_isz
    glob_bytes = bblk * n_global * 4
    required_a = 2 * feat_tile + glob_bytes + w_bytes
    required_b = 2 * (feat_tile + out_tile) + glob_bytes
    vmem_limit = _vmem_limit(max(required_a, required_b))

    # Pass A: per-batch global max of (feat @ W), bias folded in on the last tile.
    glob = pl.pallas_call(
        _make_max_kernel(bblk, nblk, n_in, n_global),
        out_shape=jax.ShapeDtypeStruct((B, 1, n_global), jnp.float32),
        grid_spec=pltpu.PrefetchScalarGridSpec(
            num_scalar_prefetch=0,
            grid=grid,
            in_specs=[
                pl.BlockSpec((bblk, nblk, n_in), lambda b, j: (b, j, 0)),
                pl.BlockSpec((n_in, n_global), lambda b, j: (0, 0)),
                pl.BlockSpec((1, n_global), lambda b, j: (0, 0)),
            ],
            out_specs=pl.BlockSpec((bblk, 1, n_global), lambda b, j: (b, 0, 0)),
        ),
        compiler_params=pltpu.CompilerParams(
            dimension_semantics=("parallel", "arbitrary"),
            vmem_limit_bytes=vmem_limit),
    )(feat, weight, bias2d)

    # Pass B: concat(feat, broadcast(glob)) written tile by tile.
    return pl.pallas_call(
        _make_concat_kernel(bblk, nblk, n_in, n_global),
        out_shape=jax.ShapeDtypeStruct((B, N, out_dim), out_dtype),
        grid_spec=pltpu.PrefetchScalarGridSpec(
            num_scalar_prefetch=0,
            grid=grid,
            in_specs=[
                pl.BlockSpec((bblk, nblk, n_in), lambda b, j: (b, j, 0)),
                pl.BlockSpec((bblk, 1, n_global), lambda b, j: (b, 0, 0)),
            ],
            out_specs=pl.BlockSpec((bblk, nblk, out_dim), lambda b, j: (b, j, 0)),
        ),
        compiler_params=pltpu.CompilerParams(
            dimension_semantics=("parallel", "parallel"),
            vmem_limit_bytes=vmem_limit),
    )(feat, glob)


def global_info_prop_ref(feat, weight, bias):
    tran = jnp.einsum("bni,ig->bng", feat, weight) + bias
    glob = jnp.max(tran, axis=-2, keepdims=True)
    glob = jnp.broadcast_to(glob, feat.shape[:-1] + (tran.shape[-1],))
    return jnp.concatenate([feat, glob], axis=-1)


if __name__ == "__main__":
    # small, module-consistent shapes
    B, N, n_in, n_global = 2, 16, 32, 32

    key = jax.random.PRNGKey(0)
    k_feat, k_w, k_b = jax.random.split(key, 3)

    feat = jax.random.normal(k_feat, (B, N, n_in), dtype=jnp.float32)

    # deterministic nn.Linear-style init: U(-1/sqrt(n_in), 1/sqrt(n_in))
    bound = 1.0 / math.sqrt(n_in)
    weight = jax.random.uniform(k_w, (n_in, n_global), jnp.float32, -bound, bound)
    bias = jax.random.uniform(k_b, (n_global,), jnp.float32, -bound, bound)

    ref = global_info_prop_ref(feat, weight, bias)

    # exact (f32) fused path -- matches the PyTorch module semantics
    out = jax.block_until_ready(global_info_prop(feat, weight, bias))
    assert out.shape == (B, N, n_in + n_global)
    assert jnp.allclose(out, ref, atol=1e-5, rtol=1e-5), "fused mismatch vs reference"

    # tiled two-pass path (used automatically for large N / tight VMEM);
    # forced here with a sub-N point tile so the running-max reduction is exercised
    out_tiled = jax.block_until_ready(
        global_info_prop(feat, weight, bias, force_tiled=True, point_block=8))
    assert out_tiled.shape == (B, N, n_in + n_global)
    assert jnp.allclose(out_tiled, ref, atol=1e-5, rtol=1e-5), "tiled mismatch vs reference"

    # optional bf16-I/O path (halves HBM traffic on v6e/v7x); loose check only
    out_bf16 = jax.block_until_ready(
        global_info_prop(feat, weight, bias, io_dtype=jnp.bfloat16))
    assert out_bf16.shape == (B, N, n_in + n_global)
    assert bool(jnp.all(jnp.isfinite(out_bf16.astype(jnp.float32))))
    assert jnp.allclose(out_bf16.astype(jnp.float32), ref, atol=1e-1, rtol=1e-1)

    print("KERNEL_OK")
</pallas_src>

<mosaic_0001>
module attributes {stable_mosaic.version = 11 : i64} {
  func.func @kernel(%arg0: i32, %arg1: memref<1x16x32xf32, #tpu.memory_space<vmem>>, %arg2: memref<32x32xf32, #tpu.memory_space<vmem>>, %arg3: memref<1x32xf32, #tpu.memory_space<vmem>>, %arg4: memref<1x16x64xf32, #tpu.memory_space<vmem>>) attributes {dimension_semantics = [#tpu.dimension_semantics<parallel>], iteration_bounds = array<i64: 2>, scalar_prefetch = 0 : i64, scratch_operands = 0 : i64, tpu.core_type = #tpu.core_type<tc>, window_params = [{transform_indices = @transform_0, window_bounds = array<i64: 1, 16, 32>}, {pipeline_mode = #tpu.pipeline_mode<synchronous>, transform_indices = @transform_1, window_bounds = array<i64: 32, 32>}, {pipeline_mode = #tpu.pipeline_mode<synchronous>, transform_indices = @transform_2, window_bounds = array<i64: 1, 32>}, {transform_indices = @transform_3, window_bounds = array<i64: 1, 16, 64>}]} {
    %c0 = arith.constant 0 : index
    %c0_0 = arith.constant 0 : index
    %c0_1 = arith.constant 0 : index
    %0 = vector.load %arg1[%c0, %c0_0, %c0_1] : memref<1x16x32xf32, #tpu.memory_space<vmem>>, vector<1x16x32xf32>
    %1 = vector.shape_cast %0 : vector<1x16x32xf32> to vector<16x32xf32>
    %c0_2 = arith.constant 0 : index
    %c0_3 = arith.constant 0 : index
    %2 = vector.load %arg2[%c0_2, %c0_3] : memref<32x32xf32, #tpu.memory_space<vmem>>, vector<32x32xf32>
    %cst = arith.constant dense<0.000000e+00> : vector<16x32xf32>
    %3 = tpu.matmul %1, %2, %cst {dimension_numbers = #tpu.dot_dimension_numbers<[1], [0], [0], [1], [0, 0, 1, 1], [], []>} : vector<16x32xf32>, vector<32x32xf32>, vector<16x32xf32> -> vector<16x32xf32>
    %4 = vector.shape_cast %3 : vector<16x32xf32> to vector<1x16x32xf32>
    %cst_4 = arith.constant dense<0xFF800000> : vector<1x32xf32>
    %5 = vector.multi_reduction <maximumf>, %4, %cst_4 [1] : vector<1x16x32xf32> to vector<1x32xf32>
    %c0_5 = arith.constant 0 : index
    %c0_6 = arith.constant 0 : index
    %6 = vector.load %arg3[%c0_5, %c0_6] : memref<1x32xf32, #tpu.memory_space<vmem>>, vector<1x32xf32>
    %7 = arith.addf %5, %6 : vector<1x32xf32>
    %c0_7 = arith.constant 0 : index
    %c0_8 = arith.constant 0 : index
    %c0_9 = arith.constant 0 : index
    %8 = vector.load %arg4[%c0_7, %c0_8, %c0_9] : memref<1x16x64xf32, #tpu.memory_space<vmem>>, vector<1x16x32xf32>
    tpu.vector_store %arg4[%c0_7, %c0_8, %c0_9], %0 {strides = array<i32>} : memref<1x16x64xf32, #tpu.memory_space<vmem>>, vector<1x16x32xf32>,
    %9 = vector.shape_cast %7 : vector<1x32xf32> to vector<1x1x32xf32>
    %10 = vector.shape_cast %9 : vector<1x1x32xf32> to vector<1x1x32xf32>
    %11 = vector.broadcast %10 : vector<1x1x32xf32> to vector<1x16x32xf32>
    %c0_10 = arith.constant 0 : index
    %c0_11 = arith.constant 0 : index
    %c32 = arith.constant 32 : index
    %12 = vector.load %arg4[%c0_10, %c0_11, %c32] : memref<1x16x64xf32, #tpu.memory_space<vmem>>, vector<1x16x32xf32>
    tpu.vector_store %arg4[%c0_10, %c0_11, %c32], %11 {strides = array<i32>} : memref<1x16x64xf32, #tpu.memory_space<vmem>>, vector<1x16x32xf32>,
    return
  }
  func.func @transform_0(%arg0: i32) -> (i32, i32, i32) {
    %c0_i32 = arith.constant 0 : i32
    %c0_i32_0 = arith.constant 0 : i32
    %c0_i32_1 = arith.constant 0 : i32
    return %arg0, %c0_i32, %c0_i32_0 : i32, i32, i32
  }
  func.func @transform_1(%arg0: i32) -> (i32, i32) {
    %c0_i32 = arith.constant 0 : i32
    %c0_i32_0 = arith.constant 0 : i32
    %c0_i32_1 = arith.constant 0 : i32
    return %c0_i32, %c0_i32_0 : i32, i32
  }
  func.func @transform_2(%arg0: i32) -> (i32, i32) {
    %c0_i32 = arith.constant 0 : i32
    %c0_i32_0 = arith.constant 0 : i32
    %c0_i32_1 = arith.constant 0 : i32
    return %c0_i32, %c0_i32_0 : i32, i32
  }
  func.func @transform_3(%arg0: i32) -> (i32, i32, i32) {
    %c0_i32 = arith.constant 0 : i32
    %c0_i32_0 = arith.constant 0 : i32
    %c0_i32_1 = arith.constant 0 : i32
    return %arg0, %c0_i32, %c0_i32_0 : i32, i32, i32
  }
}

</mosaic_0001>

<bundles_post_ra>
// kernel: tpu_custom_call.1
= control target key start
LH: loop header
LB: loop body
LE: loop exit
PB: predicated region body
PF: predicated region fallthrough
CT: control target
= control target key end

     0   :  { %8 = vsyncpa [#allocation3], 0  ;;  %s901_s0 = inlined_call_operand.hbm [shape: f32[2,16,32], index: 0, kind: input, shape index: {}]   ;;  %s902_s1 = inlined_call_operand.hbm [shape: f32[32,32], index: 1, kind: input, shape index: {}]   ;;  %s903_s2 = inlined_call_operand.vmem [shape: f32[1,32], index: 2, kind: input, shape index: {}]   ;;  %s904_s3 = inlined_call_operand.hbm [shape: f32[2,16,64], index: 3, kind: output, shape index: {}]  }
   0x1   :  { %10 = vsyncpa [#allocation3 + $0x1], 0 }
   0x2   :  { %11 = vsyncpa [#allocation6], 0 }
   0x3   :  { %12 = vsyncpa [#allocation4], 0 }
   0x4   :  { %14 = vsyncpa [#allocation4 + $0x1], 0  ;;  %s678_s12 = smov 0   ;;  %s680_s13 = smov 0  }
   0x5   :  { %s682_s14 = smov 0   ;;  %s684_s15 = smov 0  }
   0x6 LB: > { %s699_s16 = sadd.s32 4294967295, %s648_s15   ;;  %s413_s17 = sadd.s32 4294967294, %s648_s15   ;;  %s648_s15 = sphi %s684_s15, %s924_s15   ;;  %s644_s14 = sphi %s682_s14, %s923_s14   ;;  %s640_s13 = sphi %s680_s13, %s922_s13   ;;  %s636_s12 = sphi %s678_s12, %s921_s12  }
   0x7   : > { %p40_p0 = scmp.ne.s32.totalorder %s640_s13, %s636_s12  ;;  %p905_p1 = scmp.eq.s32.totalorder %s699_s16, 0 }
   0x8   : > { %p112_p3 = scmp.eq.s32.totalorder %s413_s17, 1  ;;  %p414_p5 = scmp.ge.s32.totalorder %s648_s15, 1 }
   0x9   : > { %p708_p4 = por %p905_p1, %p40_p0  ;;  %p119_p7 = scmp.lt.s32.totalorder %s648_s15, 3 }
   0xa   : > { %p713_p6 = por %p112_p3, %p40_p0  ;;  %s650_s21 = smov [#allocation5]  }
   0xb   : > { %s908_s18 = scalar_select %p708_p4, 1, 0 }
   0xc   : > { %s909_s19 = scalar_select %p713_p6, 1, 0 }
   0xd   : > { %p718_p8 = pnand %p414_p5, %p119_p7  ;;  %s131_s22 = sshll.u32 %s650_s21, 4  ;;  %s722_s22 = int_to_ptr.vmem [resolvable:$true] %s131_s22 }
   0xe   : > { %s734_s24 = sadd.s32 1, %s648_s15   ;;  %s27_s25 = sadd.s32 1, %s644_s14 }
   0xf   : > { %s910_s20 = scalar_select %p718_p8, 1, 0 }
  0x10   : > { %p466_p9 = pneg %p718_p8  ;;  %s24_s26 = ssub.s32 %s648_s15, %s734_s24 }
  0x11   : > { %s520_s29 = scalar_lea.hbm %s902_s1, 512 }
  0x12   : > { %p729_p11 = pnand %p466_p9, %p905_p1  ;;  %p521_p12 = scmp.ne.s32.totalorder %s902_s1, %s520_s29 }
  0x13   : > { %p527_p5 = scmp.lt.u32.totalorder %s520_s29, %s902_s1 }
  0x14   : > { %p522_p13 = pneg %p729_p11 }
  0x16   : > { %p523_p0 = pnand %p522_p13, %p521_p12 }
  0x18   : > { %p524_p3 = pneg %p523_p0 }
  0x1a   : > { %p529_p7 = pnand %p527_p5, %p524_p3 }
  0x1c   : > { %532 = shalt.err (!%p529_p7)
}
  0x1d   : > { %s533_s7 = scalar_lea.vmem %s722_s22, 512  ;;  %p541_p2 = scmp.lt.s32.totalorder %s722_s22, %s722_s22 }
  0x1e   : > { %p534_p9 = scmp.ne.s32.totalorder %s722_s22, %s533_s7  ;;  %p542_p6 = scmp.lt.s32.totalorder %s533_s7, %s533_s7 }
  0x20   : > { %p536_p10 = pnand %p534_p9, %p522_p13  ;;  %p543_p4 = por %p542_p6, %p541_p2 }
  0x22   : > { %p537_p1 = pneg %p536_p10 }
  0x24   : > { %p544_p8 = pnand %p543_p4, %p537_p1 }
  0x26   : > { %547 = shalt.err (!%p544_p8)
}
  0x27   : > { %s651_s8 = smov 128   ;;  %s652_s9 = smov 8  }
  0x28   : > { %469 = dma.hbm_to_vmem [thread:$0]  (!%p729_p11), %s902_s1, 512, %s722_s22, [#allocation6], %s651_s8, %s651_s8, %s652_s9  }
  0x29   : > { %p25_p1 = scmp.eq.s32.totalorder %s24_s26, 0  ;;  %p34_p2 = scmp.ne.s32.totalorder %s644_s14, %s640_s13 }
  0x2a   : > { %p35_p4 = scmp.eq.s32.totalorder %s648_s15, 0  ;;  %p479_p6 = scmp.lt.s32.totalorder %s648_s15, 2 }
  0x2b   : > { %s768_s17 = scalar_select %p25_p1, %s644_s14, %s27_s25  }
  0x2c   : > { %p36_p8 = por %p35_p4, %p34_p2  ;;  %p912_p10 = scmp.eq.s32.totalorder %s699_s16, 1 }
  0x2d   : > { %s148_s23 = sand.u32 1, %s644_s14   ;;  %s431_s27 = sshll.u32 %s648_s15, 8 }
  0x2e   : > { %p772_p12 = por %p912_p10, %p34_p2  ;;  %s417_s28 = sshll.u32 %s148_s23, 4 }
  0x2f   : > { %s781_s4 = scalar_lea.hbm %s901_s0, %s431_s27  ;;  %s152_s22 = scalar_lea.vmem [#allocation2], %s417_s28 }
  0x30   : > { %s159_s25 = sshll.u32 %s152_s22, 4  ;;  %p783_p11 = pnand %p479_p6, %p36_p8  ;;  %s787_s25 = int_to_ptr.vmem [resolvable:$true] %s159_s25 }
  0x31   : > { %s789_s5 = scalar_lea.sflag [#allocation3], %s148_s23  ;;  %s548_s6 = scalar_lea.hbm %s781_s4, 256 }
  0x32   : > { %p549_p13 = scmp.ne.s32.totalorder %s781_s4, %s548_s6  ;;  %p550_p0 = pneg %p783_p11 }
  0x33   : > { %s553_s11 = scalar_lea.hbm %s901_s0, 512  ;;  %p554_p7 = scmp.lt.u32.totalorder %s781_s4, %s901_s0 }
  0x34   : > { %p551_p3 = pnand %p550_p0, %p549_p13  ;;  %p555_p9 = scmp.lt.u32.totalorder %s553_s11, %s548_s6 }
  0x35   : > { %p557_p2 = scmp.lt.u32.totalorder %s548_s6, %s781_s4 }
  0x36   : > { %p552_p5 = pneg %p551_p3  ;;  %p556_p1 = por %p555_p9, %p554_p7 }
  0x38   : > { %p558_p4 = por %p557_p2, %p556_p1 }
  0x3a   : > { %p559_p6 = pnand %p558_p4, %p552_p5 }
  0x3c   : > { %562 = shalt.err (!%p559_p6)
}
  0x3d   : > { %s563_s23 = scalar_lea.vmem %s787_s25, 256  ;;  %s653_s29 = smov [#allocation2]  }
  0x3e   : > { %p564_p8 = scmp.ne.s32.totalorder %s787_s25, %s563_s23  ;;  %s568_s30 = sshll.u32 %s653_s29, 4  ;;  %s569_s30 = int_to_ptr.vmem [resolvable:$false] %s568_s30 }
  0x3f   : > { %s570_s22 = scalar_lea.vmem %s569_s30, 512  ;;  %p571_p3 = scmp.lt.s32.totalorder %s787_s25, %s569_s30 }
  0x40   : > { %p566_p10 = pnand %p564_p8, %p550_p0  ;;  %p572_p7 = scmp.lt.s32.totalorder %s570_s22, %s563_s23 }
  0x42   : > { %p567_p13 = pneg %p566_p10  ;;  %p573_p9 = por %p572_p7, %p571_p3 }
  0x44   : > { %p574_p1 = pnand %p573_p9, %p567_p13 }
  0x46   : > { %577 = shalt.err (!%p574_p1)
}
  0x47   : > { %473 = dma.hbm_to_vmem [thread:$0]  (!%p783_p11), %s781_s4, 256, %s787_s25, %s789_s5, %s651_s8, %s651_s8, %s652_s9  }
  0x48   : > { %p915_p0 = scmp.ne.s32.totalorder %s910_s20, 0 }
  0x49   : > { %s823_s6 = sand.u32 (!%p915_p0), 1, %s640_s13   ;;  %p916_p5 = scmp.ne.s32.totalorder (!%p915_p0), %s908_s18, 0 }
  0x4a   : > { %171 = sbr.rel (%p915_p0) target bundleno = 458 (0x1ca), region = 32  ;;  %s421_s7 = sshll.u32 (!%p915_p0), %s823_s6, 4 }
  0x4b   : > { %s174_s10 = scalar_lea.sflag (!%p915_p0), [#allocation3], %s823_s6  ;;  %s177_s11 = scalar_lea.vmem (!%p915_p0), [#allocation2], %s421_s7 }
  0x51   : > { %623 = dma.done.wait (%p916_p5), %s174_s10, 256  }
  0x52   : > { %625 = vsyncadd (%p916_p5), %s174_s10, 4294967040  ;;  %p917_p2 = scmp.eq.s32.totalorder %s699_s16, 0 }
  0x54   : > { %627 = dma.done.wait (%p917_p2), [#allocation6], 512   ;;  %p918_p11 = pmov %p917_p2 }
  0x55   : > { %vm210_vm0 = vcmask 261120   ;;  %v206_v0 = vld [vmem:[#allocation5] sm:$0xff]  ;;  %v207_v1 = vld [vmem:[#allocation5 + $0x8] sm:$0xff]  ;;  %v208_v2 = vld [vmem:[#allocation5 + $0x10] sm:$0xff]  ;;  %s836_s20 = scalar_lea.vmem [#allocation7], %s421_s7  ;;  %v305_v15 = vlaneseq  ;;  %s654_s9 = smov 32  }
  0x56   : > { %629 = vsyncadd (%p918_p11), [#allocation6], 4294966784  ;;  %v450_v3 = vpack.c.bf16 %v207_v1, %v206_v0  ;;  %v209_v4 = vld [vmem:[#allocation5 + $0x18] sm:$0xff]  ;;  %v204_v5 = vld [vmem:[%s177_s11] sm:$0xff]  ;;  %s432_s4 = sshll.u32 %s699_s16, 8  ;;  %s330_s25 = sshll.u32 %s836_s20, 4  ;;  %s855_s25 = int_to_ptr.vmem [resolvable:$true] %s330_s25 }
  0x57   : > { %v205_v6 = vld [vmem:[%s177_s11 + $0x8] sm:$0xff]  ;;  %v454_v7 = vpack.c.bf16 %v209_v4, %v208_v2  ;;  %447 = vmatprep.mubr.msk.f32.mxu0 %vm210_vm0, %v204_v5  ;;  %303 = vst.msk [vmem:[%s836_s20] sm:$0xff] %vm210_vm0, %v204_v5  ;;  %v306_v18 = vshrl.u32 %v305_v15, 7  ;;  %v301_v20 = vld [vmem:[%s903_s2] sm:$0x1]  ;;  %vm313_vm1 = vcmask 523520   ;;  %s853_s27 = scalar_lea.hbm %s904_s3, %s432_s4 }
  0x58   : > { %304 = vst.msk [vmem:[%s836_s20 + $0x8] sm:$0xff] %vm210_vm0, %v205_v6  ;;  %451 = vmatprep.subr.bf16.mxu0 %v450_v3  ;;  %s317_s28 = scalar_lea.sflag [#allocation4], %s823_s6  ;;  %s578_s23 = scalar_lea.vmem %s855_s25, 256 }
  0x59   : > { %453 = vmatpush3.bf16.msra.mxu0 %v450_v3  ;;  %v307_v22 = vsub.s32 0, %v306_v18  ;;  %p579_p4 = scmp.ne.s32.totalorder %s855_s25, %s578_s23  ;;  %s655_s16 = smov [#allocation7]  }
  0x5a   : > { %455 = vmatprep.subr.bf16.mxu0 %v454_v7  ;;  %s582_s29 = sshll.u32 %s655_s16, 4  ;;  %s583_s29 = int_to_ptr.vmem [resolvable:$false] %s582_s29 }
  0x5b   : > { %p580_p6 = pnand %p579_p4, %p772_p12  ;;  %s584_s30 = scalar_lea.vmem %s583_s29, 512 }
  0x5c   : > { %p585_p10 = scmp.lt.s32.totalorder %s855_s25, %s583_s29  ;;  %p586_p13 = scmp.lt.s32.totalorder %s584_s30, %s578_s23 }
  0x5d   : > { %457 = vmatpush3.bf16.msra.mxu0 %v454_v7  ;;  %p581_p8 = pneg %p580_p6 }
  0x5e   : > { %p587_p3 = por %p586_p13, %p585_p10 }
  0x60   : > { %448 = vmatmul.mubr.msk.f32.vlgmr.msra.gmra.mrb[0].mxu0 %vm210_vm0, %v205_v6  ;;  %p588_p7 = pnand %p587_p3, %p581_p8 }
 0x133   : > { %v449_v8 = vpop.f32.mrb[0].mxu0 }
 0x134   : > { %v293_v9 = vsel %vm210_vm0, %v449_v8, -inf  ;;  %v283_v10 = vpop.f32.mrb[1].mxu0 }
 0x135   : > { %v292_v11 = vsel %vm210_vm0, %v283_v10, -inf }
 0x136   : > { %v294_v12 = vmax.f32 %v292_v11, %v293_v9 }
 0x138   : > { %v295_v13 = vrot.slane %v294_v12, 4 }
 0x13a   : > { %v296_v14 = vmax.f32 %v294_v12, %v295_v13 }
 0x13c   : > { %v297_v16 = vrot.slane %v296_v14, 2 }
 0x13e   : > { %v298_v17 = vmax.f32 %v296_v14, %v297_v16 }
 0x140   : > { %v299_v19 = vrot.slane %v298_v17, 1 }
 0x142   : > { %v300_v21 = vmax.f32 %v298_v17, %v299_v19 }
 0x144   : > { %v302_v23 = vadd.f32 %v301_v20, %v300_v21 }
 0x146   : > { %v308_v24 = vrot.slane %v302_v23, %v307_v22 }
 0x148   : > { %310 = vrot.lane.b32.xlu0 %v308_v24, %s654_s9 }
 0x1ba   : > { %v311_v25 = vpop.permute.xlu0 %310 }
 0x1bb   : > { %314 = vst.msk [vmem:[%s836_s20] sm:$0xff] %vm313_vm1, %v311_v25  ;;  %315 = vst.msk [vmem:[%s836_s20 + $0x8] sm:$0xff] %vm313_vm1, %v311_v25 }
 0x1bc   : > { %591 = shalt.err (!%p588_p7)
}
 0x1bd   : > { %s592_s22 = scalar_lea.hbm %s853_s27, 256  ;;  %s596_s11 = scalar_lea.hbm %s904_s3, 512 }
 0x1be   : > { %p593_p9 = scmp.ne.s32.totalorder %s853_s27, %s592_s22  ;;  %p597_p5 = scmp.lt.u32.totalorder %s853_s27, %s904_s3 }
 0x1bf   : > { %p598_p2 = scmp.lt.u32.totalorder %s596_s11, %s592_s22  ;;  %p600_p4 = scmp.lt.u32.totalorder %s592_s22, %s853_s27 }
 0x1c0   : > { %p594_p1 = pnand %p593_p9, %p772_p12 }
 0x1c1   : > { %p599_p11 = por %p598_p2, %p597_p5 }
 0x1c2   : > { %p595_p0 = pneg %p594_p1 }
 0x1c3   : > { %p601_p6 = por %p600_p4, %p599_p11 }
 0x1c5   : > { %p602_p8 = pnand %p601_p6, %p595_p0 }
 0x1c7   : > { %605 = shalt.err (!%p602_p8)
}
 0x1c8   : > { %s656_s8 = smov 128   ;;  %s657_s9 = smov 8  }
 0x1c9   : > { %464 = dma.vmem_to_hbm [thread:$0]  (%p772_p12), %s855_s25, 256, %s853_s27, %s317_s28, %s656_s8, %s656_s8, %s657_s9  }
 0x1ca PF: > { %s345_s4 = sand.u32 1, %s636_s12   ;;  %p919_p10 = scmp.ne.s32.totalorder %s909_s19, 0 }
 0x1cb   : > { %p920_p13 = scmp.ge.s32.totalorder %s648_s15, 2  ;;  %s346_s26 = scalar_lea.sflag [#allocation4], %s345_s4 }
 0x1cd   : > { %p475_p3 = pnand %p920_p13, %p919_p10 }
 0x1cf   : > { %631 = dma.done.wait (!%p475_p3), %s346_s26, 256  }
 0x1d0   : > { %633 = vsyncadd (!%p475_p3), %s346_s26, 4294967040  ;;  %p17_p7 = scmp.ge.s32.totalorder %s734_s24, 4   ;;  %s921_s12 = smov %s640_s13 }
 0x1d1   : > { %s922_s13 = smov %s644_s14  ;;  %s923_s14 = smov %s768_s17 }
 0x1d2   : > { %s924_s15 = smov %s734_s24  ;;  %19 = sbr.rel (!%p17_p7) target bundleno = 6 (0x6), region = 81 }
 0x1d9   :  { %351 = vsyncpa [#allocation3], 1 }
 0x1da   :  { %353 = vsyncpa [#allocation3 + $0x1], 1 }
 0x1db   :  { %354 = vsyncpa [#allocation6], 1 }
 0x1dc   :  { %355 = vsyncpa [#allocation4], 1 }
 0x1dd   :  { %357 = vsyncpa [#allocation4 + $0x1], 1 }

</bundles_post_ra>
